<compile_context>
chip_gen: v5e
topology: v5e:2x2
jax: 0.10.0
libtpu: 0.0.40
codegen_flags: <defaults>
</compile_context>

<pallas_src>
import jax
import jax.numpy as jnp
from jax import lax
from jax.experimental import pallas as pl
from jax.experimental.pallas import tpu as pltpu


def _round_up(x, m):
    return (x + m - 1) // m * m


# ---------------------------------------------------------------------------
# Fused kernel (one batch tile):
#   xcat_ref  : (TB, n_tables)        int32, VMEM
#   xcont_ref : (TB, n_cont)          f32,   VMEM
#   wcat_ref  : (K_cat_pad, D_out_pad) f32,  VMEM (resident, folded emb @ W)
#   wcont_ref : (n_cont, D_out_pad)   f32,   VMEM (resident)
#   b_ref     : (1, D_out_pad)        f32,   VMEM (resident)
#   o_ref     : (TB, D_out_pad)       f32,   VMEM
# ---------------------------------------------------------------------------
def make_fused_kernel(cat_offsets, n_tables, n_cont, k_cat_pad, tb):
    def kernel(xcat_ref, xcont_ref, wcat_ref, wcont_ref, b_ref, o_ref):
        xcat = xcat_ref[...]                                       # (TB, n_tables)
        lane = lax.broadcasted_iota(jnp.int32, (tb, k_cat_pad), 1)

        # Combined one-hot over all categorical tables (disjoint lane ranges),
        # built fully vectorized on the VPU.
        onehot = jnp.zeros((tb, k_cat_pad), jnp.float32)
        for c in range(n_tables):                                  # static, tiny
            onehot = onehot + (
                lane == (xcat[:, c:c + 1] + cat_offsets[c])).astype(jnp.float32)

        # Categorical contribution: row-select + sum of the folded tables
        # via a single lane-aligned MXU dot (exact 0/1 selectors).
        acc = jnp.dot(onehot, wcat_ref[...],
                      preferred_element_type=jnp.float32)          # (TB, 128)

        # Continuous contribution: tiny K -> f32 broadcast-FMAs on the VPU.
        xc = xcont_ref[...]                                        # (TB, n_cont)
        wc = wcont_ref[...]                                        # (n_cont, 128)
        for c in range(n_cont):                                    # static, tiny
            acc = acc + xc[:, c:c + 1] * wc[c:c + 1, :]

        acc = acc + b_ref[...]                                     # (1, 128) bcast
        # TODO(synk): training-mode dropout (p=0.6) not implemented (identity).
        o_ref[...] = jnp.maximum(acc, 0.0)

    return kernel


# ---------------------------------------------------------------------------
# server_arch forward (functional)
# ---------------------------------------------------------------------------
def server_arch_forward(params, x_cat, x_cont, *, batch_tile=1024):
    w_cat = params["w_cat_folded"]        # (K_cat_pad, D_out_pad) f32
    w_cont = params["w_cont_pad"]         # (n_cont,   D_out_pad) f32
    b_pad = params["lin1_b_pad"]          # (1,        D_out_pad) f32
    cat_offsets = params["cat_offsets"]   # tuple[int], per-table lane offsets
    d_out = int(params["lin1_b"].shape[0])

    n_tables = len(params["emb_tables"])
    b, n_cont = x_cont.shape
    k_cat_pad, d_out_pad = (int(s) for s in w_cat.shape)

    # ---- batch tiling -------------------------------------------------------
    b8 = _round_up(b, 8)
    tb = min(batch_tile, b8)
    # v7x megacore: prefer >=2 batch tiles when the batch is big enough to split
    if _round_up(b, tb) // tb < 2 and tb > 8:
        tb = _round_up((b + 1) // 2, 8)
    b_pad_rows = _round_up(b, tb)
    n_tiles = b_pad_rows // tb

    x_cat_i = x_cat.astype(jnp.int32)
    x_cont_f = x_cont.astype(jnp.float32)
    if b_pad_rows != b:                   # ragged tail only; no-op when tb | B
        x_cat_i = jnp.pad(x_cat_i, ((0, b_pad_rows - b), (0, 0)))
        x_cont_f = jnp.pad(x_cont_f, ((0, b_pad_rows - b), (0, 0)))

    kernel = make_fused_kernel(cat_offsets, n_tables, n_cont, k_cat_pad, tb)

    flops = 2 * b_pad_rows * (k_cat_pad + n_cont) * d_out_pad
    bytes_accessed = (x_cat_i.size * 4 + x_cont_f.size * 4
                      + int(w_cat.size) * 4 + int(w_cont.size) * 4
                      + int(b_pad.size) * 4 + b_pad_rows * d_out_pad * 4)
    cost = pl.CostEstimate(flops=int(flops), transcendentals=0,
                           bytes_accessed=int(bytes_accessed))

    out = pl.pallas_call(
        kernel,
        out_shape=jax.ShapeDtypeStruct((b_pad_rows, d_out_pad), jnp.float32),
        grid_spec=pltpu.PrefetchScalarGridSpec(
            num_scalar_prefetch=0,
            grid=(n_tiles,),
            in_specs=[
                pl.BlockSpec((tb, n_tables), lambda i: (i, 0)),       # x_cat
                pl.BlockSpec((tb, n_cont), lambda i: (i, 0)),         # x_cont
                pl.BlockSpec((k_cat_pad, d_out_pad), lambda i: (0, 0)),  # W_cat'
                pl.BlockSpec((n_cont, d_out_pad), lambda i: (0, 0)),     # W_cont
                pl.BlockSpec((1, d_out_pad), lambda i: (0, 0)),          # bias
            ],
            out_specs=pl.BlockSpec((tb, d_out_pad), lambda i: (i, 0)),
        ),
        compiler_params=pltpu.CompilerParams(
            dimension_semantics=("parallel",)),
        cost_estimate=cost,
    )(x_cat_i, x_cont_f, w_cat, w_cont, b_pad)

    return out[:b, :d_out]


# pure-JAX reference (matches the PyTorch module in eval mode)
def server_arch_reference(params, x_cat, x_cont):
    embs = [jnp.take(t, x_cat[:, i], axis=0)
            for i, t in enumerate(params["emb_tables"])]
    x = jnp.concatenate(embs + [x_cont.astype(jnp.float32)], axis=1)
    return jax.nn.relu(x @ params["lin1_w"] + params["lin1_b"])


def init_params(key, embedding_sizes, n_cont):
    keys = jax.random.split(key, len(embedding_sizes) + 2)
    emb_tables = []
    for k, (categories, size) in zip(keys[:len(embedding_sizes)], embedding_sizes):
        # nn.Embedding default init: N(0, 1)
        emb_tables.append(jax.random.normal(k, (categories, size), jnp.float32))

    n_emb = sum(size for _, size in embedding_sizes)
    assert n_emb == 250, "module hardcodes n_emb=250; embedding dims must sum to 250"
    d_in = 250 + n_cont
    d_out = 64
    # nn.Linear default init: U(-1/sqrt(fan_in), 1/sqrt(fan_in))
    bound = 1.0 / jnp.sqrt(jnp.array(d_in, jnp.float32))
    lin1_w = jax.random.uniform(keys[-2], (d_in, d_out), jnp.float32, -bound, bound)
    lin1_b = jax.random.uniform(keys[-1], (d_out,), jnp.float32, -bound, bound)

    # ---- kernel-ready folded / padded weights (once, off the hot path) ------
    d_out_pad = _round_up(d_out, 128)     # lane-dense output stores
    widths = [size for _, size in embedding_sizes]
    cats = [categories for categories, _ in embedding_sizes]
    row_off = [0]
    for w in widths[:-1]:
        row_off.append(row_off[-1] + w)
    cat_off = [0]
    for c in cats[:-1]:
        cat_off.append(cat_off[-1] + c)
    k_cat = sum(cats)
    k_cat_pad = _round_up(k_cat, 128)

    # Fold each embedding table through its slice of lin1_w:
    #   onehot_c @ (tbl_c @ W_c) == tbl_c[idx] @ W_c   (exact row selection)
    folded = [jnp.dot(tbl, lin1_w[row_off[c]:row_off[c] + widths[c], :],
                      precision=lax.Precision.HIGHEST)
              for c, tbl in enumerate(emb_tables)]
    w_cat_folded = jnp.zeros((k_cat_pad, d_out_pad), jnp.float32)
    for c, f in enumerate(folded):
        w_cat_folded = w_cat_folded.at[cat_off[c]:cat_off[c] + cats[c], :d_out].set(f)

    w_cont_pad = jnp.zeros((n_cont, d_out_pad), jnp.float32)
    w_cont_pad = w_cont_pad.at[:, :d_out].set(lin1_w[250:250 + n_cont, :])

    lin1_b_pad = jnp.zeros((1, d_out_pad), jnp.float32)
    lin1_b_pad = lin1_b_pad.at[0, :d_out].set(lin1_b)

    return {"emb_tables": emb_tables,
            "lin1_w": lin1_w, "lin1_b": lin1_b,
            "w_cat_folded": w_cat_folded, "w_cont_pad": w_cont_pad,
            "lin1_b_pad": lin1_b_pad, "cat_offsets": tuple(cat_off)}


if __name__ == "__main__":
    key = jax.random.PRNGKey(0)

    # Embedding dims sum to 250 (matches the hardcoded self.n_emb = 250).
    embedding_sizes = [(10, 50), (8, 100), (6, 100)]
    n_cont = 6
    batch = 8

    k_params, k_cat, k_cont = jax.random.split(key, 3)
    params = init_params(k_params, embedding_sizes, n_cont)

    # Categorical inputs: one column per embedding table, valid index ranges.
    cols = []
    for i, (categories, _) in enumerate(embedding_sizes):
        kc = jax.random.fold_in(k_cat, i)
        cols.append(jax.random.randint(kc, (batch, 1), 0, categories, dtype=jnp.int32))
    x_cat = jnp.concatenate(cols, axis=1)                                   # (8, 3)
    x_cont = jax.random.normal(k_cont, (batch, n_cont), dtype=jnp.float32)  # (8, 6)

    out = server_arch_forward(params, x_cat, x_cont)                        # (8, 64)
    jax.block_until_ready(out)

    ref = server_arch_reference(params, x_cat, x_cont)

    assert out.shape == (batch, 64)
    assert bool(jnp.all(out >= 0.0))  # ReLU output is non-negative
    assert bool(jnp.allclose(out, ref, rtol=2e-2, atol=2e-2)), \
        float(jnp.max(jnp.abs(out - ref)))
    print("KERNEL_OK")
</pallas_src>

<mosaic_0001>
module attributes {stable_mosaic.version = 11 : i64} {
  func.func @kernel(%arg0: i32, %arg1: memref<8x3xi32, #tpu.memory_space<vmem>>, %arg2: memref<8x6xf32, #tpu.memory_space<vmem>>, %arg3: memref<128x128xf32, #tpu.memory_space<vmem>>, %arg4: memref<6x128xf32, #tpu.memory_space<vmem>>, %arg5: memref<1x128xf32, #tpu.memory_space<vmem>>, %arg6: memref<8x128xf32, #tpu.memory_space<vmem>>) attributes {dimension_semantics = [#tpu.dimension_semantics<parallel>], iteration_bounds = array<i64: 1>, scalar_prefetch = 0 : i64, scratch_operands = 0 : i64, tpu.core_type = #tpu.core_type<tc>, window_params = [{transform_indices = @transform_0, window_bounds = array<i64: 8, 3>}, {transform_indices = @transform_1, window_bounds = array<i64: 8, 6>}, {pipeline_mode = #tpu.pipeline_mode<synchronous>, transform_indices = @transform_2, window_bounds = array<i64: 128, 128>}, {pipeline_mode = #tpu.pipeline_mode<synchronous>, transform_indices = @transform_3, window_bounds = array<i64: 6, 128>}, {pipeline_mode = #tpu.pipeline_mode<synchronous>, transform_indices = @transform_4, window_bounds = array<i64: 1, 128>}, {transform_indices = @transform_5, window_bounds = array<i64: 8, 128>}]} {
    %c0 = arith.constant 0 : index
    %c0_0 = arith.constant 0 : index
    %0 = vector.load %arg1[%c0, %c0_0] : memref<8x3xi32, #tpu.memory_space<vmem>>, vector<8x3xi32>
    %1 = tpu.iota {dimensions = array<i32: 1>} : vector<8x128xi32>
    %cst = arith.constant 0.000000e+00 : f32
    %2 = vector.broadcast %cst : f32 to vector<8x128xf32>
    %3 = vector.extract_strided_slice %0 {offsets = [0, 0], sizes = [8, 1], strides = [1, 1]} : vector<8x3xi32> to vector<8x1xi32>
    %c0_i32 = arith.constant 0 : i32
    %4 = vector.broadcast %c0_i32 : i32 to vector<8x1xi32>
    %5 = arith.addi %3, %4 : vector<8x1xi32>
    %6 = vector.broadcast %5 : vector<8x1xi32> to vector<8x128xi32>
    %7 = arith.cmpi eq, %1, %6 : vector<8x128xi32>
    %8 = arith.extui %7 : vector<8x128xi1> to vector<8x128xi32>
    %9 = arith.sitofp %8 : vector<8x128xi32> to vector<8x128xf32>
    %10 = arith.addf %2, %9 : vector<8x128xf32>
    %11 = vector.extract_strided_slice %0 {offsets = [0, 1], sizes = [8, 1], strides = [1, 1]} : vector<8x3xi32> to vector<8x1xi32>
    %c10_i32 = arith.constant 10 : i32
    %12 = vector.broadcast %c10_i32 : i32 to vector<8x1xi32>
    %13 = arith.addi %11, %12 : vector<8x1xi32>
    %14 = vector.broadcast %13 : vector<8x1xi32> to vector<8x128xi32>
    %15 = arith.cmpi eq, %1, %14 : vector<8x128xi32>
    %16 = arith.extui %15 : vector<8x128xi1> to vector<8x128xi32>
    %17 = arith.sitofp %16 : vector<8x128xi32> to vector<8x128xf32>
    %18 = arith.addf %10, %17 : vector<8x128xf32>
    %19 = vector.extract_strided_slice %0 {offsets = [0, 2], sizes = [8, 1], strides = [1, 1]} : vector<8x3xi32> to vector<8x1xi32>
    %c18_i32 = arith.constant 18 : i32
    %20 = vector.broadcast %c18_i32 : i32 to vector<8x1xi32>
    %21 = arith.addi %19, %20 : vector<8x1xi32>
    %22 = vector.broadcast %21 : vector<8x1xi32> to vector<8x128xi32>
    %23 = arith.cmpi eq, %1, %22 : vector<8x128xi32>
    %24 = arith.extui %23 : vector<8x128xi1> to vector<8x128xi32>
    %25 = arith.sitofp %24 : vector<8x128xi32> to vector<8x128xf32>
    %26 = arith.addf %18, %25 : vector<8x128xf32>
    %c0_1 = arith.constant 0 : index
    %c0_2 = arith.constant 0 : index
    %27 = vector.load %arg3[%c0_1, %c0_2] : memref<128x128xf32, #tpu.memory_space<vmem>>, vector<128x128xf32>
    %cst_3 = arith.constant dense<0.000000e+00> : vector<8x128xf32>
    %28 = tpu.matmul %26, %27, %cst_3 {dimension_numbers = #tpu.dot_dimension_numbers<[1], [0], [0], [1], [0, 0, 1, 1], [], []>} : vector<8x128xf32>, vector<128x128xf32>, vector<8x128xf32> -> vector<8x128xf32>
    %c0_4 = arith.constant 0 : index
    %c0_5 = arith.constant 0 : index
    %29 = vector.load %arg2[%c0_4, %c0_5] : memref<8x6xf32, #tpu.memory_space<vmem>>, vector<8x6xf32>
    %c0_6 = arith.constant 0 : index
    %c0_7 = arith.constant 0 : index
    %30 = vector.load %arg4[%c0_6, %c0_7] : memref<6x128xf32, #tpu.memory_space<vmem>>, vector<6x128xf32>
    %31 = vector.extract_strided_slice %29 {offsets = [0, 0], sizes = [8, 1], strides = [1, 1]} : vector<8x6xf32> to vector<8x1xf32>
    %32 = vector.extract_strided_slice %30 {offsets = [0, 0], sizes = [1, 128], strides = [1, 1]} : vector<6x128xf32> to vector<1x128xf32>
    %33 = vector.broadcast %31 : vector<8x1xf32> to vector<8x128xf32>
    %34 = vector.broadcast %32 : vector<1x128xf32> to vector<8x128xf32>
    %35 = arith.mulf %33, %34 : vector<8x128xf32>
    %36 = arith.addf %28, %35 : vector<8x128xf32>
    %37 = vector.extract_strided_slice %29 {offsets = [0, 1], sizes = [8, 1], strides = [1, 1]} : vector<8x6xf32> to vector<8x1xf32>
    %38 = vector.extract_strided_slice %30 {offsets = [1, 0], sizes = [1, 128], strides = [1, 1]} : vector<6x128xf32> to vector<1x128xf32>
    %39 = vector.broadcast %37 : vector<8x1xf32> to vector<8x128xf32>
    %40 = vector.broadcast %38 : vector<1x128xf32> to vector<8x128xf32>
    %41 = arith.mulf %39, %40 : vector<8x128xf32>
    %42 = arith.addf %36, %41 : vector<8x128xf32>
    %43 = vector.extract_strided_slice %29 {offsets = [0, 2], sizes = [8, 1], strides = [1, 1]} : vector<8x6xf32> to vector<8x1xf32>
    %44 = vector.extract_strided_slice %30 {offsets = [2, 0], sizes = [1, 128], strides = [1, 1]} : vector<6x128xf32> to vector<1x128xf32>
    %45 = vector.broadcast %43 : vector<8x1xf32> to vector<8x128xf32>
    %46 = vector.broadcast %44 : vector<1x128xf32> to vector<8x128xf32>
    %47 = arith.mulf %45, %46 : vector<8x128xf32>
    %48 = arith.addf %42, %47 : vector<8x128xf32>
    %49 = vector.extract_strided_slice %29 {offsets = [0, 3], sizes = [8, 1], strides = [1, 1]} : vector<8x6xf32> to vector<8x1xf32>
    %50 = vector.extract_strided_slice %30 {offsets = [3, 0], sizes = [1, 128], strides = [1, 1]} : vector<6x128xf32> to vector<1x128xf32>
    %51 = vector.broadcast %49 : vector<8x1xf32> to vector<8x128xf32>
    %52 = vector.broadcast %50 : vector<1x128xf32> to vector<8x128xf32>
    %53 = arith.mulf %51, %52 : vector<8x128xf32>
    %54 = arith.addf %48, %53 : vector<8x128xf32>
    %55 = vector.extract_strided_slice %29 {offsets = [0, 4], sizes = [8, 1], strides = [1, 1]} : vector<8x6xf32> to vector<8x1xf32>
    %56 = vector.extract_strided_slice %30 {offsets = [4, 0], sizes = [1, 128], strides = [1, 1]} : vector<6x128xf32> to vector<1x128xf32>
    %57 = vector.broadcast %55 : vector<8x1xf32> to vector<8x128xf32>
    %58 = vector.broadcast %56 : vector<1x128xf32> to vector<8x128xf32>
    %59 = arith.mulf %57, %58 : vector<8x128xf32>
    %60 = arith.addf %54, %59 : vector<8x128xf32>
    %61 = vector.extract_strided_slice %29 {offsets = [0, 5], sizes = [8, 1], strides = [1, 1]} : vector<8x6xf32> to vector<8x1xf32>
    %62 = vector.extract_strided_slice %30 {offsets = [5, 0], sizes = [1, 128], strides = [1, 1]} : vector<6x128xf32> to vector<1x128xf32>
    %63 = vector.broadcast %61 : vector<8x1xf32> to vector<8x128xf32>
    %64 = vector.broadcast %62 : vector<1x128xf32> to vector<8x128xf32>
    %65 = arith.mulf %63, %64 : vector<8x128xf32>
    %66 = arith.addf %60, %65 : vector<8x128xf32>
    %c0_8 = arith.constant 0 : index
    %c0_9 = arith.constant 0 : index
    %67 = vector.load %arg5[%c0_8, %c0_9] : memref<1x128xf32, #tpu.memory_space<vmem>>, vector<1x128xf32>
    %68 = vector.broadcast %67 : vector<1x128xf32> to vector<8x128xf32>
    %69 = arith.addf %66, %68 : vector<8x128xf32>
    %cst_10 = arith.constant 0.000000e+00 : f32
    %70 = vector.broadcast %cst_10 : f32 to vector<8x128xf32>
    %71 = arith.maximumf %69, %70 : vector<8x128xf32>
    %c0_11 = arith.constant 0 : index
    %c0_12 = arith.constant 0 : index
    %72 = vector.load %arg6[%c0_11, %c0_12] : memref<8x128xf32, #tpu.memory_space<vmem>>, vector<8x128xf32>
    tpu.vector_store %arg6[%c0_11, %c0_12], %71 {strides = array<i32>} : memref<8x128xf32, #tpu.memory_space<vmem>>, vector<8x128xf32>,
    return
  }
  func.func @transform_0(%arg0: i32) -> (i32, i32) {
    %c0_i32 = arith.constant 0 : i32
    %c0_i32_0 = arith.constant 0 : i32
    return %arg0, %c0_i32 : i32, i32
  }
  func.func @transform_1(%arg0: i32) -> (i32, i32) {
    %c0_i32 = arith.constant 0 : i32
    %c0_i32_0 = arith.constant 0 : i32
    return %arg0, %c0_i32 : i32, i32
  }
  func.func @transform_2(%arg0: i32) -> (i32, i32) {
    %c0_i32 = arith.constant 0 : i32
    %c0_i32_0 = arith.constant 0 : i32
    %c0_i32_1 = arith.constant 0 : i32
    return %c0_i32, %c0_i32_0 : i32, i32
  }
  func.func @transform_3(%arg0: i32) -> (i32, i32) {
    %c0_i32 = arith.constant 0 : i32
    %c0_i32_0 = arith.constant 0 : i32
    %c0_i32_1 = arith.constant 0 : i32
    return %c0_i32, %c0_i32_0 : i32, i32
  }
  func.func @transform_4(%arg0: i32) -> (i32, i32) {
    %c0_i32 = arith.constant 0 : i32
    %c0_i32_0 = arith.constant 0 : i32
    %c0_i32_1 = arith.constant 0 : i32
    return %c0_i32, %c0_i32_0 : i32, i32
  }
  func.func @transform_5(%arg0: i32) -> (i32, i32) {
    %c0_i32 = arith.constant 0 : i32
    %c0_i32_0 = arith.constant 0 : i32
    return %arg0, %c0_i32 : i32, i32
  }
}

</mosaic_0001>

<bundles_post_ra>
// kernel: tpu_custom_call.1
= control target key start
LH: loop header
LB: loop body
LE: loop exit
PB: predicated region body
PF: predicated region fallthrough
CT: control target
= control target key end

     0   :  { %10 = vsyncpa [#allocation3], 0  ;;  %s345_s0 = inlined_call_operand.vmem [shape: s32[8,3], index: 0, kind: input, shape index: {}]   ;;  %s346_s1 = inlined_call_operand.vmem [shape: f32[8,6], index: 1, kind: input, shape index: {}]   ;;  %s347_s2 = inlined_call_operand.hbm [shape: f32[128,128], index: 2, kind: input, shape index: {}]   ;;  %s348_s3 = inlined_call_operand.hbm [shape: f32[6,128], index: 3, kind: input, shape index: {}]   ;;  %s349_s4 = inlined_call_operand.vmem [shape: f32[1,128], index: 4, kind: input, shape index: {}]   ;;  %s350_s5 = inlined_call_operand.hbm [shape: f32[8,128], index: 5, kind: output, shape index: {}]  }
   0x1   :  { %11 = vsyncpa [#allocation6], 0 }
   0x2   :  { %12 = vsyncpa [#allocation4], 0  ;;  %s21_s20 = sshll.u32 %s347_s2, 4  ;;  %s285_s21 = smov [#allocation2]   ;;  %s22_s20 = int_to_ptr.hbm [resolvable:$true] %s21_s20 }
   0x3   :  { %s23_s22 = sshll.u32 %s285_s21, 4  ;;  %s35_s25 = sshll.u32 %s348_s3, 4  ;;  %s24_s22 = int_to_ptr.vmem [resolvable:$true] %s23_s22  ;;  %s36_s25 = int_to_ptr.hbm [resolvable:$true] %s35_s25 }
   0x4   :  { %s286_s26 = smov 128   ;;  %s287_s27 = smov 8  }
   0x5   :  { %29 = dma.hbm_to_vmem [thread:$0]  %s22_s20, 2048, %s24_s22, [#allocation3], %s286_s26, %s286_s26, %s287_s27  }
   0x6   :  { %s288_s28 = smov [#allocation5]  }
   0x7   :  { %s37_s29 = sshll.u32 %s288_s28, 4  ;;  %s38_s29 = int_to_ptr.vmem [resolvable:$true] %s37_s29 }
   0x8   :  { %40 = dma.hbm_to_vmem [thread:$0]  %s36_s25, 128, %s38_s29, [#allocation6]  }
   0x9   :  { %279 = dma.done.wait [#allocation3], 2048  }
   0xa   :  { %280 = vsyncadd [#allocation3], 4294965248 }
   0xb   :  { %281 = dma.done.wait [#allocation6], 128  }
   0xc   :  { %282 = vsyncadd [#allocation6], 4294967168  ;;  %v289_v0 = vmov 0   ;;  %v290_v1 = vmov 2   ;;  %v291_v2 = vmov 1   ;;  %v51_v3 = vld [vmem:[%s345_s0] sm:$0xff]  ;;  %v52_v25 = vlaneseq }
   0xd   :  { %197 = vset.pattern.permute.xlu0 %v289_v0  ;;  %199 = vset.pattern.permute.xlu1 %v290_v1  ;;  %v92_v4 = vld [vmem:[#allocation2 + $0x78] sm:$0xff]  ;;  %v91_v5 = vld [vmem:[#allocation2 + $0x70] sm:$0xff]  ;;  %v69_v6 = vadd.s32 18, %v51_v3  ;;  %v90_v7 = vld [vmem:[#allocation2 + $0x68] sm:$0xff]  ;;  %v61_v9 = vadd.s32 10, %v51_v3  ;;  %v292_v23 = vmov 5  }
   0xe   :  { %201 = vset.pattern.permute.xlu2 %v291_v2  ;;  %55 = vperm.xlu0 %197, %v51_v3   ;;  %v89_v8 = vld [vmem:[#allocation2 + $0x60] sm:$0xff]  ;;  %v88_v10 = vld [vmem:[#allocation2 + $0x58] sm:$0xff]  ;;  %v87_v11 = vld [vmem:[#allocation2 + $0x50] sm:$0xff]  ;;  %v293_v24 = vmov 3   ;;  %v294_v27 = vmov 4   ;;  %v53_v28 = vand.u32 127, %v52_v25 }
   0xf   :  { %102 = vmatpush.msra.mxu0 %v92_v4  ;;  %71 = vperm.xlu1 %199, %v69_v6   ;;  %v86_v12 = vld [vmem:[#allocation2 + $0x48] sm:$0xff]  ;;  %v85_v13 = vld [vmem:[#allocation2 + $0x40] sm:$0xff]  ;;  %v84_v14 = vld [vmem:[#allocation2 + $0x38] sm:$0xff]  ;;  %v295_v31 = vmov 0.0   ;;  %s296_s7 = smov [#allocation7]   ;;  %s171_s11 = sshll.u32 %s350_s5, 4  ;;  %s172_s11 = int_to_ptr.hbm [resolvable:$true] %s171_s11 }
  0x10   :  { %v83_v15 = vld [vmem:[#allocation2 + $0x30] sm:$0xff]  ;;  %v82_v16 = vld [vmem:[#allocation2 + $0x28] sm:$0xff]  ;;  %v81_v17 = vld [vmem:[#allocation2 + $0x20] sm:$0xff]  ;;  %s169_s8 = sshll.u32 %s296_s7, 4  ;;  %s170_s8 = int_to_ptr.vmem [resolvable:$true] %s169_s8 }
  0x11   :  { %103 = vmatpush.msra.mxu0 %v91_v5  ;;  %v80_v18 = vld [vmem:[#allocation2 + $0x18] sm:$0xff]  ;;  %v79_v19 = vld [vmem:[#allocation2 + $0x10] sm:$0xff]  ;;  %v78_v20 = vld [vmem:[#allocation2 + $0x8] sm:$0xff] }
  0x12   :  { %v77_v21 = vld [vmem:[#allocation2] sm:$0xff] }
  0x13   :  { %104 = vmatpush.msra.mxu0 %v90_v7  ;;  %v93_v22 = vld [vmem:[%s346_s1] sm:$0xff] }
  0x14   :  { %123 = vperm.xlu2 %201, %v93_v22   ;;  %v94_v40 = vld [vmem:[#allocation5] sm:$0x3f] }
  0x15   :  { %105 = vmatpush.msra.mxu0 %v89_v8  ;;  %v100_v41 = vperm.slane %v94_v40, 0  ;;  %v126_v42 = vperm.slane %v94_v40, 1  ;;  %v133_v44 = vperm.slane %v94_v40, 2  ;;  %v140_v45 = vperm.slane %v94_v40, 3  ;;  %v206_v62 = vld [vmem:[%s349_s4] ss:$0 sm:$0xff] }
  0x16   :  { %198 = vset.pattern.permute.xlu0 %v291_v2  ;;  %v147_v50 = vperm.slane %v94_v40, 4  ;;  %v154_v55 = vperm.slane %v94_v40, 5 }
  0x17   :  { %106 = vmatpush.msra.mxu0 %v88_v10  ;;  %63 = vperm.xlu0 %198, %v61_v9  }
  0x18   :  { %200 = vset.pattern.permute.xlu1 %v289_v0 }
  0x19   :  { %107 = vmatpush.msra.mxu0 %v87_v11  ;;  %97 = vperm.xlu1 %200, %v93_v22  }
  0x1b   :  { %108 = vmatpush.msra.mxu0 %v86_v12 }
  0x1c   :  { %202 = vset.pattern.permute.xlu2 %v290_v1 }
  0x1d   :  { %109 = vmatpush.msra.mxu0 %v85_v13  ;;  %130 = vperm.xlu2 %202, %v93_v22  }
  0x1f   :  { %110 = vmatpush.msra.mxu0 %v84_v14  ;;  %205 = vset.pattern.permute.xlu0 %v292_v23 }
  0x20   :  { %151 = vperm.xlu0 %205, %v93_v22  }
  0x21   :  { %111 = vmatpush.msra.mxu0 %v83_v15  ;;  %203 = vset.pattern.permute.xlu1 %v293_v24 }
  0x22   :  { %137 = vperm.xlu1 %203, %v93_v22  }
  0x23   :  { %112 = vmatpush.msra.mxu0 %v82_v16 }
  0x25   :  { %113 = vmatpush.msra.mxu0 %v81_v17  ;;  %204 = vset.pattern.permute.xlu2 %v294_v27 }
  0x26   :  { %144 = vperm.xlu2 %204, %v93_v22  }
  0x27   :  { %114 = vmatpush.msra.mxu0 %v80_v18 }
  0x29   :  { %115 = vmatpush.msra.mxu0 %v79_v19 }
  0x2b   :  { %116 = vmatpush.msra.mxu0 %v78_v20 }
  0x2d   :  { %117 = vmatpush.msra.mxu0 %v77_v21 }
  0x6e   :  { %v124_v37 = vpop.permute.xlu2 %123 }
  0x6f   :  { %v127_v48 = vmul.f32 %v126_v42, %v124_v37 }
  0x77   :  { %v131_v39 = vpop.permute.xlu2 %130 }
  0x78   :  { %v134_v52 = vmul.f32 %v133_v44, %v131_v39 }
  0x80   :  { %v56_v26 = vpop.permute.xlu0 %55  ;;  %v145_v51 = vpop.permute.xlu2 %144 }
  0x81   :  { %v72_v29 = vpop.permute.xlu1 %71  ;;  %vm57_vm0 = vcmp.eq.s32.totalorder %v53_v28, %v56_v26  ;;  %v148_v58 = vmul.f32 %v147_v50, %v145_v51 }
  0x82   :  { %vm73_vm1 = vcmp.eq.s32.totalorder %v53_v28, %v72_v29  ;;  %v182_v32 = vsel %vm57_vm0, 1.0, %v295_v31 }
  0x83   :  { %v184_v34 = vsel %vm73_vm1, 1.0, %v295_v31 }
  0x89   :  { %v64_v30 = vpop.permute.xlu0 %63 }
  0x8a   :  { %vm65_vm2 = vcmp.eq.s32.totalorder %v53_v28, %v64_v30 }
  0x8b   :  { %v183_v33 = vsel %vm65_vm2, 1.0, %v295_v31  ;;  %v98_v38 = vpop.permute.xlu1 %97 }
  0x8c   :  { %v68_v35 = vadd.f32 %v183_v33, %v182_v32  ;;  %v101_v43 = vmul.f32 %v100_v41, %v98_v38 }
  0x8e   :  { %v76_v36 = vadd.f32 %v184_v34, %v68_v35 }
  0x90   :  { %118 = vmatmul.f32.vlgmr.msra.gmra.mxu0 %v76_v36 }
  0x92   :  { %v152_v56 = vpop.permute.xlu0 %151 }
  0x93   :  { %v155_v60 = vmul.f32 %v154_v55, %v152_v56 }
  0x94   :  { %v138_v47 = vpop.permute.xlu1 %137 }
  0x95   :  { %v141_v54 = vmul.f32 %v140_v45, %v138_v47 }
 0x10d   :  { %v119_v46 = vpop.f32.mrf.mxu0 }
 0x10e   :  { %v120_v49 = vadd.f32 %v119_v46, %v101_v43 }
 0x110   :  { %v128_v53 = vadd.f32 %v127_v48, %v120_v49 }
 0x112   :  { %v135_v57 = vadd.f32 %v134_v52, %v128_v53 }
 0x114   :  { %v142_v59 = vadd.f32 %v141_v54, %v135_v57 }
 0x116   :  { %v149_v61 = vadd.f32 %v148_v58, %v142_v59 }
 0x118   :  { %v156_v63 = vadd.f32 %v155_v60, %v149_v61 }
 0x11a   :  { %v161_v0 = vadd.f32 %v206_v62, %v156_v63 }
 0x11c   :  { %v162_v1 = vmax.f32 %v161_v0, 0.0 }
 0x11e   :  { %163 = vst [vmem:[#allocation7] sm:$0xff] %v162_v1 }
 0x11f   :  { %174 = dma.vmem_to_hbm [thread:$0]  %s170_s8, 128, %s172_s11, [#allocation4]  }
 0x120   :  { %283 = dma.done.wait [#allocation4], 128  }
 0x121   :  { %284 = vsyncadd [#allocation4], 4294967168 }
 0x122   :  { %179 = vsyncpa [#allocation3], 1 }
 0x123   :  { %180 = vsyncpa [#allocation6], 1 }
 0x124   :  { %181 = vsyncpa [#allocation4], 1 }

</bundles_post_ra>
